<compile_context>
chip_gen: v7x
topology: tpu7x:2x2x1
jax: 0.10.0
libtpu: 0.0.40
codegen_flags: <defaults>
</compile_context>

<pallas_src>
import functools

import jax
import jax.numpy as jnp
from jax.experimental import pallas as pl
from jax.experimental.pallas import tpu as pltpu


def _round_up(x: int, m: int) -> int:
    return ((x + m - 1) // m) * m


def _perceptron_kernel_single_k(x_ref, wt_ref, b_ref, o_ref):
    """Whole K in one tile: x_ref (tm, K), wt_ref (K, tn), b_ref (1, tn)."""
    out = jnp.dot(x_ref[...], wt_ref[...], preferred_element_type=jnp.float32)
    out = out + b_ref[...]            # (tm, tn) + (1, tn) broadcast, f32
    o_ref[...] = jnp.maximum(out, 0.0).astype(o_ref.dtype)


def _perceptron_kernel_multi_k(x_ref, wt_ref, b_ref, o_ref, acc_ref):
    """K-tiled: x_ref (tm, tk), wt_ref (tk, tn), b_ref (1, tn), o_ref (tm, tn)."""
    k = pl.program_id(2)

    @pl.when(k == 0)
    def _():
        acc_ref[...] = jnp.zeros_like(acc_ref)

    # MXU matmul, f32 accumulation.
    acc_ref[...] += jnp.dot(
        x_ref[...], wt_ref[...], preferred_element_type=jnp.float32
    )

    @pl.when(k == pl.num_programs(2) - 1)
    def _():
        out = acc_ref[...] + b_ref[...]   # broadcast bias add, f32
        out = jnp.maximum(out, 0.0)       # ReLU on the VPU
        o_ref[...] = out.astype(o_ref.dtype)


@functools.partial(jax.jit, static_argnames=("tm", "tn", "tk", "compute_dtype"))
def perceptron_forward(x, weight, bias=None, *, tm=512, tn=256, tk=512,
                       compute_dtype=None):
    """relu(x @ weight.T + bias).

    x:      (B, I) float
    weight: (O, I) float  (torch.nn.Linear layout)
    bias:   (O,)   float or None
    compute_dtype: optional dtype (e.g. jnp.bfloat16) for the matmul inputs;
                   accumulation stays in f32, output in x.dtype.
    Returns (B, O) in x.dtype.
    """
    B, I = x.shape
    O, I2 = weight.shape
    assert I == I2, f"shape mismatch: x {x.shape} vs weight {weight.shape}"
    out_dtype = x.dtype

    if bias is None:
        bias = jnp.zeros((O,), dtype=jnp.float32)

    # Clamp tiles for small problems, keeping TPU-friendly (8, 128) multiples.
    tm = min(tm, _round_up(B, 8))
    tn = min(tn, _round_up(O, 128))
    tk = min(tk, _round_up(I, 128))

    Bp = _round_up(B, tm)
    Op = _round_up(O, tn)
    Ip = _round_up(I, tk)

    # Pre-transpose the weight once (one-time relayout, outside the kernel) and
    # zero-pad everything to tile multiples. Zero K-padding contributes nothing
    # to the dot product; padded rows/cols are sliced off after the call.
    wT = weight.T  # (I, O)
    x_p = jnp.pad(x, ((0, Bp - B), (0, Ip - I)))
    wT_p = jnp.pad(wT, ((0, Ip - I), (0, Op - O)))
    b_p = jnp.pad(bias.astype(jnp.float32).reshape(1, O), ((0, 0), (0, Op - O)))

    if compute_dtype is not None:
        x_p = x_p.astype(compute_dtype)
        wT_p = wT_p.astype(compute_dtype)

    in_bytes = x_p.dtype.itemsize
    cost = pl.CostEstimate(
        flops=2 * Bp * Ip * Op,
        transcendentals=0,
        bytes_accessed=(Bp * Ip + Ip * Op) * in_bytes
        + Op * 4
        + Bp * Op * jnp.dtype(out_dtype).itemsize,
    )
    nk = Ip // tk

    if nk == 1:
        # Fast path: no K reduction axis, no accumulator scratch.
        out_padded = pl.pallas_call(
            _perceptron_kernel_single_k,
            out_shape=jax.ShapeDtypeStruct((Bp, Op), out_dtype),
            grid_spec=pltpu.PrefetchScalarGridSpec(
                num_scalar_prefetch=0,
                grid=(Bp // tm, Op // tn),
                in_specs=[
                    pl.BlockSpec((tm, Ip), lambda i, j: (i, 0)),   # x tile
                    pl.BlockSpec((Ip, tn), lambda i, j: (0, j)),   # W^T tile
                    pl.BlockSpec((1, tn), lambda i, j: (0, j)),    # bias tile
                ],
                out_specs=pl.BlockSpec((tm, tn), lambda i, j: (i, j)),
            ),
            compiler_params=pltpu.CompilerParams(
                dimension_semantics=("parallel", "parallel"),
                vmem_limit_bytes=64 * 1024 * 1024,
            ),
            cost_estimate=cost,
        )(x_p, wT_p, b_p)
    else:
        out_padded = pl.pallas_call(
            _perceptron_kernel_multi_k,
            out_shape=jax.ShapeDtypeStruct((Bp, Op), out_dtype),
            grid_spec=pltpu.PrefetchScalarGridSpec(
                num_scalar_prefetch=0,
                grid=(Bp // tm, Op // tn, nk),
                in_specs=[
                    pl.BlockSpec((tm, tk), lambda i, j, k: (i, k)),   # x tile
                    pl.BlockSpec((tk, tn), lambda i, j, k: (k, j)),   # W^T tile
                    pl.BlockSpec((1, tn), lambda i, j, k: (0, j)),    # bias tile
                ],
                out_specs=pl.BlockSpec((tm, tn), lambda i, j, k: (i, j)),
                scratch_shapes=[pltpu.VMEM((tm, tn), jnp.float32)],
            ),
            compiler_params=pltpu.CompilerParams(
                dimension_semantics=("parallel", "parallel", "arbitrary"),
                vmem_limit_bytes=64 * 1024 * 1024,
            ),
            cost_estimate=cost,
        )(x_p, wT_p, b_p)

    return out_padded[:B, :O]


if __name__ == "__main__":
    key = jax.random.PRNGKey(0)

    # --- Small test: shapes from the module docstring example -------------
    batch_size, in_size, out_size = 3, 40, 16
    kx, kw, kb, k2 = jax.random.split(key, 4)

    x = jax.random.normal(kx, (batch_size, in_size), dtype=jnp.float32)
    bound = 1.0 / (in_size ** 0.5)  # nn.Linear-style init
    weight = jax.random.uniform(
        kw, (out_size, in_size), minval=-bound, maxval=bound, dtype=jnp.float32
    )
    bias = jax.random.uniform(
        kb, (out_size,), minval=-bound, maxval=bound, dtype=jnp.float32
    )

    out = perceptron_forward(x, weight, bias)
    jax.block_until_ready(out)
    ref = jnp.maximum(x @ weight.T + bias, 0.0)
    assert out.shape == (batch_size, out_size)
    assert jnp.allclose(out, ref, atol=1e-5, rtol=1e-5), "small-case mismatch"

    # bias=False variant of the module.
    out_nb = perceptron_forward(x, weight, None)
    jax.block_until_ready(out_nb)
    ref_nb = jnp.maximum(x @ weight.T, 0.0)
    assert jnp.allclose(out_nb, ref_nb, atol=1e-5, rtol=1e-5), "no-bias mismatch"

    # --- Larger test: exercises the multi-K (3-D grid) reduction path -----
    B2, I2_, O2 = 256, 640, 384
    kx2, kw2, kb2 = jax.random.split(k2, 3)
    x2 = jax.random.normal(kx2, (B2, I2_), dtype=jnp.float32)
    b2 = 1.0 / (I2_ ** 0.5)
    w2 = jax.random.uniform(kw2, (O2, I2_), minval=-b2, maxval=b2,
                            dtype=jnp.float32)
    bias2 = jax.random.uniform(kb2, (O2,), minval=-b2, maxval=b2,
                               dtype=jnp.float32)

    out2 = perceptron_forward(x2, w2, bias2)
    jax.block_until_ready(out2)
    ref2 = jnp.maximum(x2 @ w2.T + bias2, 0.0)
    assert out2.shape == (B2, O2)
    assert jnp.allclose(out2, ref2, atol=1e-3, rtol=1e-3), "tiled-case mismatch"

    print("KERNEL_OK")
</pallas_src>

<mosaic_0001>
module attributes {stable_mosaic.version = 11 : i64} {
  func.func @_perceptron_kernel_single_k(%arg0: i32, %arg1: i32, %arg2: memref<8x128xf32, #tpu.memory_space<vmem>>, %arg3: memref<128x128xf32, #tpu.memory_space<vmem>>, %arg4: memref<1x128xf32, #tpu.memory_space<vmem>>, %arg5: memref<8x128xf32, #tpu.memory_space<vmem>>) attributes {dimension_semantics = [#tpu.dimension_semantics<parallel>, #tpu.dimension_semantics<parallel>], iteration_bounds = array<i64: 1, 1>, scalar_prefetch = 0 : i64, scratch_operands = 0 : i64, tpu.core_type = #tpu.core_type<tc>, window_params = [{transform_indices = @transform_0, window_bounds = array<i64: 8, 128>}, {transform_indices = @transform_1, window_bounds = array<i64: 128, 128>}, {transform_indices = @transform_2, window_bounds = array<i64: 1, 128>}, {transform_indices = @transform_3, window_bounds = array<i64: 8, 128>}]} {
    %c0 = arith.constant 0 : index
    %c0_0 = arith.constant 0 : index
    %0 = vector.load %arg2[%c0, %c0_0] : memref<8x128xf32, #tpu.memory_space<vmem>>, vector<8x128xf32>
    %c0_1 = arith.constant 0 : index
    %c0_2 = arith.constant 0 : index
    %1 = vector.load %arg3[%c0_1, %c0_2] : memref<128x128xf32, #tpu.memory_space<vmem>>, vector<128x128xf32>
    %cst = arith.constant dense<0.000000e+00> : vector<8x128xf32>
    %2 = tpu.matmul %0, %1, %cst {dimension_numbers = #tpu.dot_dimension_numbers<[1], [0], [0], [1], [0, 0, 1, 1], [], []>} : vector<8x128xf32>, vector<128x128xf32>, vector<8x128xf32> -> vector<8x128xf32>
    %c0_3 = arith.constant 0 : index
    %c0_4 = arith.constant 0 : index
    %3 = vector.load %arg4[%c0_3, %c0_4] : memref<1x128xf32, #tpu.memory_space<vmem>>, vector<1x128xf32>
    %4 = vector.broadcast %3 : vector<1x128xf32> to vector<8x128xf32>
    %5 = arith.addf %2, %4 : vector<8x128xf32>
    %cst_5 = arith.constant 0.000000e+00 : f32
    %6 = vector.broadcast %cst_5 : f32 to vector<8x128xf32>
    %7 = arith.maximumf %5, %6 : vector<8x128xf32>
    %c0_6 = arith.constant 0 : index
    %c0_7 = arith.constant 0 : index
    %8 = vector.load %arg5[%c0_6, %c0_7] : memref<8x128xf32, #tpu.memory_space<vmem>>, vector<8x128xf32>
    tpu.vector_store %arg5[%c0_6, %c0_7], %7 {strides = array<i32>} : memref<8x128xf32, #tpu.memory_space<vmem>>, vector<8x128xf32>,
    return
  }
  func.func @transform_0(%arg0: i32, %arg1: i32) -> (i32, i32) {
    %c0_i32 = arith.constant 0 : i32
    %c0_i32_0 = arith.constant 0 : i32
    return %arg0, %c0_i32 : i32, i32
  }
  func.func @transform_1(%arg0: i32, %arg1: i32) -> (i32, i32) {
    %c0_i32 = arith.constant 0 : i32
    %c0_i32_0 = arith.constant 0 : i32
    return %c0_i32, %arg1 : i32, i32
  }
  func.func @transform_2(%arg0: i32, %arg1: i32) -> (i32, i32) {
    %c0_i32 = arith.constant 0 : i32
    %c0_i32_0 = arith.constant 0 : i32
    return %c0_i32, %arg1 : i32, i32
  }
  func.func @transform_3(%arg0: i32, %arg1: i32) -> (i32, i32) {
    %c0_i32 = arith.constant 0 : i32
    return %arg0, %arg1 : i32, i32
  }
}

</mosaic_0001>

<bundles_post_ra>
// kernel: perceptron_forward.1
= control target key start
LH: loop header
LB: loop body
LE: loop exit
PB: predicated region body
PF: predicated region fallthrough
CT: control target
= control target key end

     0   :  { %8 = vsyncpa [#allocation3], 0  ;;  %s421_s0 = inlined_call_operand.hbm [shape: f32[8,128], index: 0, kind: input, shape index: {}]   ;;  %s422_s1 = inlined_call_operand.hbm [shape: f32[128,128], index: 1, kind: input, shape index: {}]   ;;  %s423_s2 = inlined_call_operand.hbm [shape: f32[1,128], index: 2, kind: input, shape index: {}]   ;;  %s424_s3 = inlined_call_operand.hbm [shape: f32[8,128], index: 3, kind: output, shape index: {}]  }
   0x1   :  { %9 = vsyncpa [#allocation6], 0 }
   0x2   :  { %10 = vsyncpa [#allocation4], 0  ;;  %s344_s12 = smov [#allocation5]   ;;  %s250_s16 = scalar_lea.hbm %s422_s1, 2048 }
   0x3   :  { %s26_s13 = sshll.u32 %s344_s12, 4  ;;  %p251_p0 = scmp.ne.s32.totalorder %s422_s1, %s250_s16  ;;  %s27_s13 = int_to_ptr.vmem [resolvable:$true] %s26_s13 }
   0x4   :  { %p254_p1 = scmp.lt.u32.totalorder %s250_s16, %s422_s1 }
   0x6   :  { %p256_p2 = pnand %p254_p1, %p251_p0 }
   0x8   :  { %259 = shalt.err (!%p256_p2)
}
   0x9   :  { %s260_s21 = scalar_lea.vmem %s27_s13, 2048  ;;  %p265_p4 = scmp.lt.s32.totalorder %s27_s13, %s27_s13 }
   0xa   :  { %p261_p3 = scmp.ne.s32.totalorder %s27_s13, %s260_s21  ;;  %p266_p5 = scmp.lt.s32.totalorder %s260_s21, %s260_s21 }
   0xc   :  { %p267_p6 = por %p266_p5, %p265_p4 }
   0xe   :  { %p268_p7 = pnand %p267_p6, %p261_p3 }
  0x10   :  { %271 = shalt.err (!%p268_p7)
}
  0x11   :  { %s345_s22 = smov 128   ;;  %s346_s23 = smov 8  }
  0x12   :  { %32 = dma.hbm_to_vmem [thread:$0]  %s422_s1, 2048, %s27_s13, [#allocation6], %s345_s22, %s345_s22, %s346_s23  }
  0x13   :  { %s347_s26 = smov [#allocation2]   ;;  %s348_s28 = smov [#allocation7]  }
  0x14   :  { %s17_s27 = sshll.u32 %s347_s26, 4  ;;  %s39_s29 = sshll.u32 %s348_s28, 4  ;;  %s18_s27 = int_to_ptr.vmem [resolvable:$true] %s17_s27  ;;  %s40_s29 = int_to_ptr.vmem [resolvable:$true] %s39_s29 }
  0x15   :  { %s272_s5 = scalar_lea.hbm %s421_s0, 128 }
  0x16   :  { %p273_p8 = scmp.ne.s32.totalorder %s421_s0, %s272_s5  ;;  %p276_p9 = scmp.lt.u32.totalorder %s272_s5, %s421_s0 }
  0x18   :  { %p278_p10 = pnand %p276_p9, %p273_p8 }
  0x1a   :  { %281 = shalt.err (!%p278_p10)
}
  0x1b   :  { %s282_s1 = scalar_lea.vmem %s18_s27, 128  ;;  %p287_p12 = scmp.lt.s32.totalorder %s18_s27, %s18_s27 }
  0x1c   :  { %p283_p11 = scmp.ne.s32.totalorder %s18_s27, %s282_s1  ;;  %p288_p13 = scmp.lt.s32.totalorder %s282_s1, %s282_s1 }
  0x1e   :  { %p289_p0 = por %p288_p13, %p287_p12 }
  0x20   :  { %p290_p1 = pnand %p289_p0, %p283_p11 }
  0x22   :  { %293 = shalt.err (!%p290_p1)
}
  0x23   :  { %20 = dma.hbm_to_vmem [thread:$0]  %s421_s0, 128, %s18_s27, [#allocation3]  }
  0x24   :  { %s294_s14 = scalar_lea.hbm %s423_s2, 16 }
  0x25   :  { %p295_p2 = scmp.ne.s32.totalorder %s423_s2, %s294_s14  ;;  %p298_p3 = scmp.lt.u32.totalorder %s294_s14, %s423_s2 }
  0x27   :  { %p300_p4 = pnand %p298_p3, %p295_p2 }
  0x29   :  { %303 = shalt.err (!%p300_p4)
}
  0x2a   :  { %s304_s19 = scalar_lea.vmem %s40_s29, 16  ;;  %s308_s20 = scalar_lea.vmem %s40_s29, 32 }
  0x2b   :  { %p305_p5 = scmp.ne.s32.totalorder %s40_s29, %s304_s19  ;;  %p309_p6 = scmp.lt.s32.totalorder %s40_s29, %s40_s29 }
  0x2c   :  { %p310_p7 = scmp.lt.s32.totalorder %s308_s20, %s304_s19 }
  0x2e   :  { %p311_p8 = por %p310_p7, %p309_p6 }
  0x30   :  { %p312_p9 = pnand %p311_p8, %p305_p5 }
  0x32   :  { %315 = shalt.err (!%p312_p9)
}
  0x33   :  { %42 = dma.hbm_to_vmem [thread:$0]  %s423_s2, 16, %s40_s29, [#allocation6]  }
  0x34   :  { %338 = dma.done.wait [#allocation3], 128  }
  0x35   :  { %339 = vsyncadd [#allocation3], 4294967168 }
  0x36   :  { %340 = dma.done.wait [#allocation6], 2064  }
  0x37   :  { %341 = vsyncadd [#allocation6], 4294965232  ;;  %v349_v0 = vmov 0.0|0.0   ;;  %vm350_vm0 = vmmov 0   ;;  %v351_v1 = vmov 0.0   ;;  %v53_v2 = vld [vmem:[#allocation5] sm:$0xff] }
  0x38   :  { %217 = vmatprep.subr.bf16.mxu0 %v349_v0  ;;  %214 = vmatprep.mubr.msk.f32.mxu0 %vm350_vm0, %v351_v1  ;;  %v54_v3 = vld [vmem:[#allocation5 + $0x8] sm:$0xff]  ;;  %v55_v4 = vld [vmem:[#allocation5 + $0x10] sm:$0xff]  ;;  %v56_v6 = vld [vmem:[#allocation5 + $0x18] sm:$0xff]  ;;  %s352_s2 = smov [#allocation8]  }
  0x39   :  { %v218_v5 = vpack.c.bf16 %v54_v3, %v53_v2  ;;  %v221_v7 = vpack.c.bf16 %v56_v6, %v55_v4  ;;  %v57_v8 = vld [vmem:[#allocation5 + $0x20] sm:$0xff]  ;;  %v58_v9 = vld [vmem:[#allocation5 + $0x28] sm:$0xff]  ;;  %v59_v11 = vld [vmem:[#allocation5 + $0x30] sm:$0xff]  ;;  %s154_s22 = sshll.u32 %s352_s2, 4  ;;  %s155_s22 = int_to_ptr.vmem [resolvable:$true] %s154_s22 }
  0x3a   :  { %v224_v10 = vpack.c.bf16 %v58_v9, %v57_v8  ;;  %v60_v12 = vld [vmem:[#allocation5 + $0x38] sm:$0xff]  ;;  %v61_v14 = vld [vmem:[#allocation5 + $0x40] sm:$0xff]  ;;  %v62_v15 = vld [vmem:[#allocation5 + $0x48] sm:$0xff]  ;;  %s316_s23 = scalar_lea.vmem %s155_s22, 128  ;;  %p321_p11 = scmp.lt.s32.totalorder %s155_s22, %s155_s22 }
  0x3b   :  { %219 = vmatpush3.bf16.msra.mxu0 %v218_v5  ;;  %v227_v13 = vpack.c.bf16 %v60_v12, %v59_v11  ;;  %v230_v16 = vpack.c.bf16 %v62_v15, %v61_v14  ;;  %v63_v17 = vld [vmem:[#allocation5 + $0x50] sm:$0xff]  ;;  %v64_v18 = vld [vmem:[#allocation5 + $0x58] sm:$0xff]  ;;  %v65_v20 = vld [vmem:[#allocation5 + $0x60] sm:$0xff]  ;;  %p317_p10 = scmp.ne.s32.totalorder %s155_s22, %s316_s23  ;;  %p322_p12 = scmp.lt.s32.totalorder %s316_s23, %s316_s23 }
  0x3c   :  { %220 = vmatprep.subr.bf16.mxu0 %v349_v0  ;;  %v233_v19 = vpack.c.bf16 %v64_v18, %v63_v17  ;;  %v66_v21 = vld [vmem:[#allocation5 + $0x68] sm:$0xff]  ;;  %v67_v23 = vld [vmem:[#allocation5 + $0x70] sm:$0xff]  ;;  %v68_v24 = vld [vmem:[#allocation5 + $0x78] sm:$0xff] }
  0x3d   :  { %v236_v22 = vpack.c.bf16 %v66_v21, %v65_v20  ;;  %v239_v25 = vpack.c.bf16 %v68_v24, %v67_v23  ;;  %v52_v26 = vld [vmem:[#allocation2] sm:$0xff]  ;;  %v164_v27 = vld [vmem:[#allocation7] ss:$0 sm:$0xff]  ;;  %p323_p13 = por %p322_p12, %p321_p11 }
  0x3f   :  { %222 = vmatpush3.bf16.msra.mxu0 %v221_v7  ;;  %p324_p0 = pnand %p323_p13, %p317_p10 }
  0x40   :  { %223 = vmatprep.subr.bf16.mxu0 %v349_v0 }
  0x43   :  { %225 = vmatpush3.bf16.msra.mxu0 %v224_v10 }
  0x44   :  { %226 = vmatprep.subr.bf16.mxu0 %v349_v0 }
  0x47   :  { %228 = vmatpush3.bf16.msra.mxu0 %v227_v13 }
  0x48   :  { %229 = vmatprep.subr.bf16.mxu0 %v349_v0 }
  0x4b   :  { %231 = vmatpush3.bf16.msra.mxu0 %v230_v16 }
  0x4c   :  { %232 = vmatprep.subr.bf16.mxu0 %v349_v0 }
  0x4f   :  { %234 = vmatpush3.bf16.msra.mxu0 %v233_v19 }
  0x50   :  { %235 = vmatprep.subr.bf16.mxu0 %v349_v0 }
  0x53   :  { %237 = vmatpush3.bf16.msra.mxu0 %v236_v22 }
  0x54   :  { %238 = vmatprep.subr.bf16.mxu0 %v349_v0 }
  0x57   :  { %240 = vmatpush3.bf16.msra.mxu0 %v239_v25 }
  0x5a   :  { %215 = vmatmul.mubr.f32.vlgmr.msra.gmra.mrb[0].mxu0 %v52_v26 }
 0x12d   :  { %v142_v28 = vpop.f32.mrb[0].mxu0 }
 0x12e   :  { %v143_v29 = vadd.f32 %v164_v27, %v142_v28  ;;  %v216_v30 = vpop.f32.mrb[1].mxu0 }
 0x130   :  { %v146_v31 = vmax.f32 %v143_v29, 0.0 }
 0x132   :  { %147 = vst [vmem:[#allocation8] sm:$0xff] %v146_v31 }
 0x133   :  { %327 = shalt.err (!%p324_p0)
}
 0x134   :  { %s328_s26 = scalar_lea.hbm %s424_s3, 128 }
 0x135   :  { %p329_p1 = scmp.ne.s32.totalorder %s424_s3, %s328_s26  ;;  %p332_p2 = scmp.lt.u32.totalorder %s328_s26, %s424_s3 }
 0x137   :  { %p334_p3 = pnand %p332_p2, %p329_p1 }
 0x139   :  { %337 = shalt.err (!%p334_p3)
}
 0x13a   :  { %157 = dma.vmem_to_hbm [thread:$0]  %s155_s22, 128, %s424_s3, [#allocation4]  }
 0x13b   :  { %342 = dma.done.wait [#allocation4], 128  }
 0x13c   :  { %343 = vsyncadd [#allocation4], 4294967168 }
 0x13d   :  { %161 = vsyncpa [#allocation3], 1 }
 0x13e   :  { %162 = vsyncpa [#allocation6], 1 }
 0x13f   :  { %163 = vsyncpa [#allocation4], 1 }

</bundles_post_ra>
